<compile_context>
chip_gen: v7x
topology: tpu7x:2x2x1
jax: 0.10.0
libtpu: 0.0.40
codegen_flags: <defaults>
</compile_context>

<pallas_src>
import functools

import jax
import jax.numpy as jnp
from jax.experimental import pallas as pl
from jax.experimental.pallas import tpu as pltpu


def _top1_max_kernel(logit_ref, diag_ref, partial_ref, *, n_total):
    """One (TM, N) row block -> scalar partial sum of sum_ij softmax_ij * term_ij."""
    i = pl.program_id(0)
    x = logit_ref[...].astype(jnp.float32)                 # (TM, N)
    diag = diag_ref[...].astype(jnp.float32)               # (TM, 1)
    tm = x.shape[0]

    # Validity mask for pad rows of the last (partial) block. OOB block contents are
    # undefined, but every reduction below is per-row, so masking only the final per-row
    # contribution is sufficient (and saves a full-tile select).
    local_row = jax.lax.broadcasted_iota(jnp.int32, (tm, 1), 0)
    row_valid = (local_row + i * tm) < n_total              # (TM, 1)

    # Row-wise stable softmax pieces; ex is reused for sigmoid(x - diag).
    row_max = jnp.max(x, axis=1, keepdims=True)              # (TM, 1)
    ex = jnp.exp(x - row_max)                                # (TM, N)  full-tile exp #1
    row_den = jnp.sum(ex, axis=1, keepdims=True)             # (TM, 1)

    # sigmoid(x - diag) = ex / (ex + exp(diag - row_max)). eps guards the 0/0 -> NaN case
    # (both exps underflowed); those elements have zero softmax weight so the value there
    # is irrelevant.  Reciprocal on the EUP (idle slot) instead of a VALU divide.
    c = jnp.exp(diag - row_max)                              # (TM, 1)
    eps = jnp.float32(1e-12)
    sig_diff = ex * pl.reciprocal(ex + c + eps, approx=True)       # (TM, N)

    # sigmoid(x^2) = 1 / (1 + exp(-x^2)); x^2 >= 0 keeps exp in (0, 1].
    sig_sq = pl.reciprocal(1.0 + jnp.exp(-(x * x)), approx=True)   # (TM, N) exp #2

    # Fused softmax: sum_j softmax_ij * term_ij = (sum_j ex_ij * term_ij) / row_den_i.
    row_num = jnp.sum(ex * (sig_diff + sig_sq), axis=1, keepdims=True)        # (TM, 1)
    row_contrib = jnp.where(
        row_valid, row_num * pl.reciprocal(row_den, approx=True), 0.0)        # (TM, 1)

    partial_ref[0, 0] = jnp.sum(row_contrib)


def _choose_block_rows(n: int) -> int:
    """Row tile: >=2 blocks when possible, multiple of 8, VMEM-bounded."""
    if n <= 16:
        return n                                            # single full-extent block
    tm = max(8, ((n + 15) // 16) * 8)                       # ~n/2, rounded up to 8
    # Keep (double-buffered input + ~6 live f32 (TM, N) temps) under ~32 MiB: fits every
    # generation's VMEM (v7x physical = 64 MiB) with headroom.
    per_row_bytes = 8 * n * 4
    cap = max(8, ((32 * 1024 * 1024) // per_row_bytes) // 8 * 8)
    return min(tm, cap, 512)


def top1_max(logit: jax.Array, block_rows: int | None = None) -> jax.Array:
    """Pallas TPU implementation of TOP1_max. Returns a scalar float32."""
    n = logit.shape[0]
    assert logit.shape == (n, n), "TOP1_max expects a square logit matrix"

    tm = _choose_block_rows(n) if block_rows is None else block_rows
    if tm != n:
        tm = max(8, (tm // 8) * 8)                          # (8, 128) sublane constraint
    num_blocks = pl.cdiv(n, tm)

    # Diagonal precomputed once outside the kernel: (N, 1) f32 column, streamed per block.
    diag = jnp.diagonal(logit).reshape(n, 1).astype(jnp.float32)

    # Explicit scoped-VMEM limit sized from the tile (default scoped limit is 32 MiB).
    est_bytes = 8 * tm * n * 4 + 4 * tm * 4
    vmem_limit = int(min(100 * 1024 * 1024,
                         max(32 * 1024 * 1024, int(est_bytes * 1.25))))

    kernel = functools.partial(_top1_max_kernel, n_total=n)

    partials = pl.pallas_call(
        kernel,
        out_shape=jax.ShapeDtypeStruct((num_blocks, 1), jnp.float32),
        grid_spec=pltpu.PrefetchScalarGridSpec(
            num_scalar_prefetch=0,
            grid=(num_blocks,),
            in_specs=[
                pl.BlockSpec((tm, n), lambda i: (i, 0)),    # logit row block
                pl.BlockSpec((tm, 1), lambda i: (i, 0)),    # matching diag slice
            ],
            out_specs=pl.BlockSpec(
                (1, 1), lambda i: (i, 0), memory_space=pltpu.MemorySpace.SMEM
            ),
        ),
        compiler_params=pltpu.CompilerParams(
            dimension_semantics=("parallel",),
            vmem_limit_bytes=vmem_limit,
        ),
    )(logit, diag)

    # Tiny final reduction + the single divide by N*N happen outside the kernel.
    return jnp.sum(partials) / jnp.float32(n * n)


def top1_max_ref(logit: jax.Array) -> jax.Array:
    """Plain-JAX reference mirroring the PyTorch module."""
    sm = jax.nn.softmax(logit, axis=1)
    diff = logit - jnp.diag(logit)[:, None]
    return jnp.mean(sm * (jax.nn.sigmoid(diff) + jax.nn.sigmoid(logit ** 2)))


if __name__ == "__main__":
    # Small square logit matrix, matching the PyTorch (sessions, items) layout.
    N = 8
    logit = jax.random.normal(jax.random.PRNGKey(0), (N, N), dtype=jnp.float32)
    loss = top1_max(logit)
    jax.block_until_ready(loss)
    ref = top1_max_ref(logit)
    # Tolerance loosened for pl.reciprocal(approx=True).
    assert jnp.allclose(loss, ref, atol=2e-3, rtol=2e-3), (loss, ref)

    # Exercise the tiled path: grid > 1 and N not a multiple of the row tile
    # (partial last block -> validates pad-row masking + per-block diag slices).
    N2 = 40
    logit2 = jax.random.normal(jax.random.PRNGKey(1), (N2, N2), dtype=jnp.float32)
    loss2 = top1_max(logit2, block_rows=16)
    jax.block_until_ready(loss2)
    ref2 = top1_max_ref(logit2)
    assert jnp.allclose(loss2, ref2, atol=2e-3, rtol=2e-3), (loss2, ref2)

    print("KERNEL_OK")
</pallas_src>

<mosaic_0001>
module attributes {stable_mosaic.version = 11 : i64} {
  func.func @_top1_max_kernel(%arg0: i32, %arg1: memref<8x8xf32, #tpu.memory_space<vmem>>, %arg2: memref<8x1xf32, #tpu.memory_space<vmem>>, %arg3: memref<1x1xf32, #tpu.memory_space<smem>>) attributes {dimension_semantics = [#tpu.dimension_semantics<parallel>], iteration_bounds = array<i64: 1>, scalar_prefetch = 0 : i64, scratch_operands = 0 : i64, tpu.core_type = #tpu.core_type<tc>, window_params = [{transform_indices = @transform_0, window_bounds = array<i64: 8, 8>}, {transform_indices = @transform_1, window_bounds = array<i64: 8, 1>}, {transform_indices = @transform_2, window_bounds = array<i64: 1, 1>}]} {
    %c0 = arith.constant 0 : index
    %c0_0 = arith.constant 0 : index
    %0 = vector.load %arg1[%c0, %c0_0] : memref<8x8xf32, #tpu.memory_space<vmem>>, vector<8x8xf32>
    %c0_1 = arith.constant 0 : index
    %c0_2 = arith.constant 0 : index
    %1 = vector.load %arg2[%c0_1, %c0_2] : memref<8x1xf32, #tpu.memory_space<vmem>>, vector<8x1xf32>
    %2 = tpu.iota {dimensions = array<i32: 0>} : vector<8x1xi32>
    %c8_i32 = arith.constant 8 : i32
    %3 = arith.muli %arg0, %c8_i32 : i32
    %4 = vector.broadcast %3 : i32 to vector<8x1xi32>
    %5 = arith.addi %2, %4 : vector<8x1xi32>
    %c8_i32_3 = arith.constant 8 : i32
    %6 = vector.broadcast %c8_i32_3 : i32 to vector<8x1xi32>
    %7 = arith.cmpi slt, %5, %6 : vector<8x1xi32>
    %cst = arith.constant dense<0xFF800000> : vector<8xf32>
    %8 = vector.multi_reduction <maximumf>, %0, %cst [1] : vector<8x8xf32> to vector<8xf32>
    %9 = vector.shape_cast %8 : vector<8xf32> to vector<8x1xf32>
    %10 = vector.broadcast %9 : vector<8x1xf32> to vector<8x8xf32>
    %11 = arith.subf %0, %10 : vector<8x8xf32>
    %12 = math.exp %11 : vector<8x8xf32>
    %cst_4 = arith.constant dense<0.000000e+00> : vector<8xf32>
    %13 = vector.multi_reduction <add>, %12, %cst_4 [1] : vector<8x8xf32> to vector<8xf32>
    %14 = vector.shape_cast %13 : vector<8xf32> to vector<8x1xf32>
    %15 = arith.subf %1, %9 : vector<8x1xf32>
    %16 = math.exp %15 : vector<8x1xf32>
    %17 = vector.broadcast %16 : vector<8x1xf32> to vector<8x8xf32>
    %18 = arith.addf %12, %17 : vector<8x8xf32>
    %cst_5 = arith.constant 9.99999996E-13 : f32
    %19 = vector.broadcast %cst_5 : f32 to vector<8x8xf32>
    %20 = arith.addf %18, %19 : vector<8x8xf32>
    %21 = tpu.reciprocal %20 {approx = true} : vector<8x8xf32> -> vector<8x8xf32>
    %22 = arith.mulf %12, %21 : vector<8x8xf32>
    %23 = arith.mulf %0, %0 : vector<8x8xf32>
    %cst_6 = arith.constant 0.000000e+00 : f32
    %24 = vector.broadcast %cst_6 : f32 to vector<8x8xf32>
    %25 = arith.subf %24, %23 : vector<8x8xf32>
    %26 = math.exp %25 : vector<8x8xf32>
    %cst_7 = arith.constant 1.000000e+00 : f32
    %27 = vector.broadcast %cst_7 : f32 to vector<8x8xf32>
    %28 = arith.addf %27, %26 : vector<8x8xf32>
    %29 = tpu.reciprocal %28 {approx = true} : vector<8x8xf32> -> vector<8x8xf32>
    %30 = arith.addf %22, %29 : vector<8x8xf32>
    %31 = arith.mulf %12, %30 : vector<8x8xf32>
    %cst_8 = arith.constant dense<0.000000e+00> : vector<8xf32>
    %32 = vector.multi_reduction <add>, %31, %cst_8 [1] : vector<8x8xf32> to vector<8xf32>
    %33 = vector.shape_cast %32 : vector<8xf32> to vector<8x1xf32>
    %34 = tpu.reciprocal %14 {approx = true} : vector<8x1xf32> -> vector<8x1xf32>
    %35 = arith.mulf %33, %34 : vector<8x1xf32>
    %cst_9 = arith.constant 0.000000e+00 : f32
    %36 = vector.broadcast %cst_9 : f32 to vector<8x1xf32>
    %37 = arith.select %7, %35, %36 : vector<8x1xi1>, vector<8x1xf32>
    %38 = vector.shape_cast %37 : vector<8x1xf32> to vector<1x8x1xf32>
    %cst_10 = arith.constant dense<0.000000e+00> : vector<1xf32>
    %39 = vector.multi_reduction <add>, %38, %cst_10 [1, 2] : vector<1x8x1xf32> to vector<1xf32>
    %40 = vector.shape_cast %39 : vector<1xf32> to vector<1x1x1xf32>
    %41 = vector.extract %40[0, 0, 0] : f32 from vector<1x1x1xf32>
    %c0_11 = arith.constant 0 : index
    %c0_12 = arith.constant 0 : index
    %42 = memref.load %arg3[%c0_11, %c0_12] : memref<1x1xf32, #tpu.memory_space<smem>>
    memref.store %41, %arg3[%c0_11, %c0_12] : memref<1x1xf32, #tpu.memory_space<smem>>
    return
  }
  func.func @transform_0(%arg0: i32) -> (i32, i32) {
    %c0_i32 = arith.constant 0 : i32
    %c0_i32_0 = arith.constant 0 : i32
    return %arg0, %c0_i32 : i32, i32
  }
  func.func @transform_1(%arg0: i32) -> (i32, i32) {
    %c0_i32 = arith.constant 0 : i32
    %c0_i32_0 = arith.constant 0 : i32
    return %arg0, %c0_i32 : i32, i32
  }
  func.func @transform_2(%arg0: i32) -> (i32, i32) {
    %c0_i32 = arith.constant 0 : i32
    %c0_i32_0 = arith.constant 0 : i32
    return %arg0, %c0_i32 : i32, i32
  }
}

</mosaic_0001>

<bundles_post_ra>
// kernel: tpu_custom_call.1
= control target key start
LH: loop header
LB: loop body
LE: loop exit
PB: predicated region body
PF: predicated region fallthrough
CT: control target
= control target key end

     0   :  { %vm20_vm0 = vcmask 64512   ;;  %s149_s0 = inlined_call_operand.vmem [shape: f32[8,8], index: 0, kind: input, shape index: {}]   ;;  %s150_s1 = inlined_call_operand.vmem [shape: f32[8,1], index: 1, kind: input, shape index: {}]   ;;  %s151_s2 = inlined_call_operand.hbm [shape: f32[1,1], index: 2, kind: output, shape index: {}]  }
   0x1   :  { %v12_v0 = vld [vmem:[%s149_s0] sm:$0xff] }
   0x2   :  { %7 = vsyncpa [#allocation3], 0  ;;  %v21_v1 = vsel %vm20_vm0, %v12_v0, -inf  ;;  %v111_v2 = vmov 0   ;;  %v13_v3 = vld [vmem:[%s150_s1] sm:$0xff]  ;;  %v42_v12 = vmul.f32 %v12_v0, %v12_v0  ;;  %vm56_vm1 = vcmask 7168  }
   0x3   :  { %22 = vmax.xlane.f32.xlu0 %v21_v1  ;;  %s99_s14 = scalar_lea.hbm %s151_s2, 16 }
   0x4   :  { %86 = vset.pattern.permute.xlu0 %v111_v2  ;;  %v43_v13 = vsub.f32 0.0, %v42_v12  ;;  %p100_p0 = scmp.ne.s32.totalorder %s151_s2, %s99_s14  ;;  %p103_p1 = scmp.lt.u32.totalorder %s99_s14, %s151_s2 }
   0x6   :  { %v44_v14 = vmul.f32 1.442695, %v43_v13  ;;  %p105_p2 = pnand %p103_p1, %p100_p0 }
  0x90   :  { %v23_v4 = vpop.xlane.xlu0 %22 }
  0x91   :  { %v24_v5 = vsub.f32 %v12_v0, %v23_v4  ;;  %v30_v6 = vsub.f32 %v13_v3, %v23_v4 }
  0x93   :  { %v25_v7 = vmul.f32 1.442695, %v24_v5  ;;  %v31_v8 = vmul.f32 1.442695, %v30_v6 }
  0x95   :  { %87 = vpow2.f32 %v25_v7 }
  0x96   :  { %89 = vpow2.f32 %v31_v8 }
  0x97   :  { %91 = vpow2.f32 %v44_v14 }
  0x9f   :  { %v88_v9 = vpop.eup %87 }
  0xa0   :  { %v90_v10 = vpop.eup %89  ;;  %v27_v11 = vsel %vm20_vm0, %v88_v9, 0.0 }
  0xa1   :  { %35 = vperm.xlu0 %86, %v90_v10   ;;  %28 = vadd.xlane.f32.xlu1 %v27_v11  ;;  %v92_v15 = vpop.eup %91 }
  0xa2   :  { %v46_v16 = vadd.f32 1.0, %v92_v15 }
  0xa4   :  { %93 = vrcp.f32 %v46_v16 }
  0xae   :  { %v94_v20 = vpop.eup %93 }
 0x120   :  { %v36_v17 = vpop.permute.xlu0 %35 }
 0x121   :  { %v38_v18 = vadd.f32 %v88_v9, %v36_v17 }
 0x123   :  { %v39_v19 = vadd.f32 1e-12, %v38_v18 }
 0x125   :  { %95 = vrcp.f32 %v39_v19 }
 0x12e   :  { %v29_v26 = vpop.xlane.xlu1 %28 }
 0x12f   :  { %v96_v21 = vpop.eup %95  ;;  %97 = vrcp.f32 %v29_v26 }
 0x130   :  { %v41_v22 = vmul.f32 %v96_v21, %v88_v9 }
 0x132   :  { %v48_v23 = vadd.f32 %v94_v20, %v41_v22 }
 0x134   :  { %v49_v24 = vmul.f32 %v88_v9, %v48_v23 }
 0x136   :  { %v50_v25 = vsel %vm20_vm0, %v49_v24, 0.0 }
 0x137   :  { %51 = vadd.xlane.f32.xlu1 %v50_v25 }
 0x139   :  { %v98_v27 = vpop.eup %97 }
 0x1c4   :  { %v52_v28 = vpop.xlane.xlu1 %51 }
 0x1c5   :  { %v54_v29 = vmul.f32 %v98_v27, %v52_v28 }
 0x1c7   :  { %v57_v30 = vsel %vm56_vm1, %v54_v29, 0.0 }
 0x1c8   :  { %58 = vadd.xlane.f32.xlu1 %v57_v30 }
 0x255   :  { %v59_v31 = vpop.xlane.xlu1 %58 }
 0x256   :  { %v60_v32 = vrot.slane %v59_v31, 4 }
 0x258   :  { %v61_v33 = vadd.f32 %v60_v32, %v59_v31 }
 0x25a   :  { %v62_v34 = vrot.slane %v61_v33, 2 }
 0x25c   :  { %v63_v35 = vadd.f32 %v62_v34, %v61_v33 }
 0x25e   :  { %v64_v36 = vrot.slane %v63_v35, 1 }
 0x260   :  { %v65_v37 = vadd.f32 %v64_v36, %v63_v35 }
 0x262   :  { %82 = vpush %v65_v37 }
 0x293   :  { %s83_s0 = spop %82 }
 0x294   :  { %68 = sst [smem:[#allocation2]] %s83_s0 }
 0x295   :  { %108 = shalt.err (!%p105_p2)
}
 0x296   :  { %s112_s19 = smov [#allocation2]  }
 0x297   :  { %76 = dma.smem_to_hbm %s112_s19, 16, %s151_s2, [#allocation3]  }
 0x298   :  { %109 = dma.done.wait [#allocation3], 16  }
 0x299   :  { %110 = vsyncadd [#allocation3], 4294967280 }
 0x29a   :  { %80 = sfence }
 0x29b   :  { %81 = vsyncpa [#allocation3], 1 }

</bundles_post_ra>
